<compile_context>
chip_gen: v6e
topology: v6e:2x2x1
jax: 0.10.0
libtpu: 0.0.40
codegen_flags: <defaults>
</compile_context>

<pallas_src>
import functools

import jax
import jax.numpy as jnp
from jax.experimental import pallas as pl
from jax.experimental.pallas import tpu as pltpu


def _round_up(n: int, m: int) -> int:
    return ((n + m - 1) // m) * m


def _make_mlp_kernel(num_rest_layers: int):
    """Fused feature-major MLP kernel.

    refs = (x, w0, b0, [w_l, b_l] * num_rest_layers, w_out, b_out, o)
      x     : (1, TILE_B)   batch on the lane axis
      w0    : (H, 1)        b0    : (H, 1)
      w_l   : (H, H)        b_l   : (H, 1)
      w_out : (H, 1)        b_out : (1, 1)
      o     : (1, TILE_B)
    """

    def kernel(x_ref, *refs):
        o_ref = refs[-1]
        p = refs[:-1]
        x = x_ref[...]                                        # (1, TILE_B)

        # First layer Linear(1, H): K == 1 -> pure VPU broadcast outer product.
        h = jnp.maximum(p[0][...] * x + p[1][...], 0.0)       # (H, TILE_B)

        idx = 2
        for _ in range(num_rest_layers):
            w = p[idx][...]                                   # (H, H) = (out, in)
            b = p[idx + 1][...]                               # (H, 1)
            idx += 2
            h = jnp.dot(w, h, preferred_element_type=jnp.float32) + b
            h = jnp.maximum(h, 0.0)

        # Output layer Linear(H, 1): N == 1 -> multiply + sublane reduce.
        w_out = p[idx][...]                                   # (H, 1)
        b_out = p[idx + 1][...]                               # (1, 1)
        y = jnp.sum(w_out * h, axis=0, keepdims=True) + b_out  # (1, TILE_B)
        o_ref[...] = jax.nn.sigmoid(y)

    return kernel


@functools.partial(jax.jit, static_argnames=("num_layers", "tile_b"))
def mlp_forward(x, params_flat, num_layers=1, tile_b=512):
    """x: (B, 1) float32 -> sigmoid(MLP(x)) of shape (B, 1)."""
    B = x.shape[0]

    # Lane-dense layout: batch on the 128-lane axis, padded to the tile size.
    xt = x.reshape(1, B)
    TILE_B = min(tile_b, _round_up(B, 128))
    B_pad = _round_up(B, TILE_B)
    if B_pad != B:
        xt = jnp.pad(xt, ((0, 0), (0, B_pad - B)))

    kernel = _make_mlp_kernel(num_layers - 1)

    grid = (B_pad // TILE_B,)
    x_spec = pl.BlockSpec((1, TILE_B), lambda i: (0, i))
    out_spec = pl.BlockSpec((1, TILE_B), lambda i: (0, i))
    # Weights/biases: full-array blocks, constant index map -> resident across tiles.
    param_specs = [pl.BlockSpec(p.shape, lambda i: (0, 0)) for p in params_flat]

    out = pl.pallas_call(
        kernel,
        out_shape=jax.ShapeDtypeStruct((1, B_pad), jnp.float32),
        grid=grid,
        in_specs=[x_spec] + param_specs,
        out_specs=out_spec,
        compiler_params=pltpu.CompilerParams(
            dimension_semantics=("parallel",),  # shard batch tiles across TCs (v7x)
        ),
    )(xt, *params_flat)

    return out[:, :B].reshape(B, 1)


def init_mlp_params(key, hidden_size=32, num_layers=1, dtype=jnp.float32):
    """PyTorch nn.Linear-style init: U(-1/sqrt(fan_in), +1/sqrt(fan_in)).
    Returns list of (W_(out,in), b_(out,)) in the same layout as PyTorch."""
    sizes = [(hidden_size, 1)]
    sizes += [(hidden_size, hidden_size)] * (num_layers - 1)
    sizes += [(1, hidden_size)]
    params = []
    for (fan_out, fan_in) in sizes:
        key, kw, kb = jax.random.split(key, 3)
        bound = 1.0 / float(fan_in) ** 0.5
        w = jax.random.uniform(kw, (fan_out, fan_in), dtype=dtype,
                               minval=-bound, maxval=bound)
        b = jax.random.uniform(kb, (fan_out,), dtype=dtype,
                               minval=-bound, maxval=bound)
        params.append((w, b))
    return params


def pack_kernel_params(params):
    """Convert PyTorch-layout params to the feature-major kernel layout."""
    flat = []
    for (w, b) in params[:-1]:            # hidden layers: (out,in) weight as-is
        flat.append(w)
        flat.append(b.reshape(-1, 1))     # bias as a column
    w_out, b_out = params[-1]             # (1, H), (1,)
    flat.append(w_out.reshape(-1, 1))     # (H, 1)
    flat.append(b_out.reshape(1, 1))      # (1, 1)
    return tuple(flat)


def mlp_reference(x, params):
    """Pure-JAX reference with PyTorch semantics (batch-major)."""
    h = x
    for (w, b) in params[:-1]:
        h = jnp.maximum(h @ w.T + b, 0.0)
    w, b = params[-1]
    return jax.nn.sigmoid(h @ w.T + b)


if __name__ == "__main__":
    key = jax.random.PRNGKey(0)
    hidden_size = 32

    # (batch, num_layers): small default case + a padded multi-tile / multi-layer case.
    for (batch, num_layers) in [(8, 1), (300, 3)]:
        key, kx, kp = jax.random.split(key, 3)
        x = jax.random.normal(kx, (batch, 1), dtype=jnp.float32)
        params = init_mlp_params(kp, hidden_size=hidden_size, num_layers=num_layers)
        params_flat = pack_kernel_params(params)

        y = mlp_forward(x, params_flat, num_layers=num_layers)
        y = jax.block_until_ready(y)

        y_ref = mlp_reference(x, params)
        assert y.shape == (batch, 1)
        assert jnp.allclose(y, y_ref, atol=1e-5, rtol=1e-5), (
            f"mismatch vs reference (batch={batch}, num_layers={num_layers})"
        )

    print("KERNEL_OK")
</pallas_src>

<mosaic_0001>
module attributes {stable_mosaic.version = 11 : i64} {
  func.func @kernel(%arg0: i32, %arg1: memref<1x128xf32, #tpu.memory_space<vmem>>, %arg2: memref<32x1xf32, #tpu.memory_space<vmem>>, %arg3: memref<32x1xf32, #tpu.memory_space<vmem>>, %arg4: memref<32x1xf32, #tpu.memory_space<vmem>>, %arg5: memref<1x1xf32, #tpu.memory_space<vmem>>, %arg6: memref<1x128xf32, #tpu.memory_space<vmem>>) attributes {dimension_semantics = [#tpu.dimension_semantics<parallel>], iteration_bounds = array<i64: 1>, scalar_prefetch = 0 : i64, scratch_operands = 0 : i64, tpu.core_type = #tpu.core_type<tc>, window_params = [{transform_indices = @transform_0, window_bounds = array<i64: 1, 128>}, {pipeline_mode = #tpu.pipeline_mode<synchronous>, transform_indices = @transform_1, window_bounds = array<i64: 32, 1>}, {pipeline_mode = #tpu.pipeline_mode<synchronous>, transform_indices = @transform_2, window_bounds = array<i64: 32, 1>}, {pipeline_mode = #tpu.pipeline_mode<synchronous>, transform_indices = @transform_3, window_bounds = array<i64: 32, 1>}, {pipeline_mode = #tpu.pipeline_mode<synchronous>, transform_indices = @transform_4, window_bounds = array<i64: 1, 1>}, {transform_indices = @transform_5, window_bounds = array<i64: 1, 128>}]} {
    %c0 = arith.constant 0 : index
    %c0_0 = arith.constant 0 : index
    %0 = vector.load %arg1[%c0, %c0_0] : memref<1x128xf32, #tpu.memory_space<vmem>>, vector<1x128xf32>
    %c0_1 = arith.constant 0 : index
    %c0_2 = arith.constant 0 : index
    %1 = vector.load %arg2[%c0_1, %c0_2] : memref<32x1xf32, #tpu.memory_space<vmem>>, vector<32x1xf32>
    %2 = vector.broadcast %1 : vector<32x1xf32> to vector<32x128xf32>
    %3 = vector.broadcast %0 : vector<1x128xf32> to vector<32x128xf32>
    %4 = arith.mulf %2, %3 : vector<32x128xf32>
    %c0_3 = arith.constant 0 : index
    %c0_4 = arith.constant 0 : index
    %5 = vector.load %arg3[%c0_3, %c0_4] : memref<32x1xf32, #tpu.memory_space<vmem>>, vector<32x1xf32>
    %6 = vector.broadcast %5 : vector<32x1xf32> to vector<32x128xf32>
    %7 = arith.addf %4, %6 : vector<32x128xf32>
    %cst = arith.constant 0.000000e+00 : f32
    %8 = vector.broadcast %cst : f32 to vector<32x128xf32>
    %9 = arith.maximumf %7, %8 : vector<32x128xf32>
    %c0_5 = arith.constant 0 : index
    %c0_6 = arith.constant 0 : index
    %10 = vector.load %arg4[%c0_5, %c0_6] : memref<32x1xf32, #tpu.memory_space<vmem>>, vector<32x1xf32>
    %c0_7 = arith.constant 0 : index
    %c0_8 = arith.constant 0 : index
    %11 = vector.load %arg5[%c0_7, %c0_8] : memref<1x1xf32, #tpu.memory_space<vmem>>, vector<1x1xf32>
    %12 = vector.broadcast %10 : vector<32x1xf32> to vector<32x128xf32>
    %13 = arith.mulf %12, %9 : vector<32x128xf32>
    %cst_9 = arith.constant dense<0.000000e+00> : vector<128xf32>
    %14 = vector.multi_reduction <add>, %13, %cst_9 [0] : vector<32x128xf32> to vector<128xf32>
    %15 = vector.shape_cast %14 : vector<128xf32> to vector<1x128xf32>
    %16 = vector.broadcast %11 : vector<1x1xf32> to vector<1x128xf32>
    %17 = arith.addf %15, %16 : vector<1x128xf32>
    %18 = arith.negf %17 : vector<1x128xf32>
    %19 = math.exp %18 : vector<1x128xf32>
    %cst_10 = arith.constant 1.000000e+00 : f32
    %20 = vector.broadcast %cst_10 : f32 to vector<1x128xf32>
    %21 = arith.addf %20, %19 : vector<1x128xf32>
    %22 = arith.divf %20, %21 : vector<1x128xf32>
    %c0_11 = arith.constant 0 : index
    %c0_12 = arith.constant 0 : index
    %23 = vector.load %arg6[%c0_11, %c0_12] : memref<1x128xf32, #tpu.memory_space<vmem>>, vector<1x128xf32>
    tpu.vector_store %arg6[%c0_11, %c0_12], %22 {strides = array<i32>} : memref<1x128xf32, #tpu.memory_space<vmem>>, vector<1x128xf32>,
    return
  }
  func.func @transform_0(%arg0: i32) -> (i32, i32) {
    %c0_i32 = arith.constant 0 : i32
    %c0_i32_0 = arith.constant 0 : i32
    return %c0_i32, %arg0 : i32, i32
  }
  func.func @transform_1(%arg0: i32) -> (i32, i32) {
    %c0_i32 = arith.constant 0 : i32
    %c0_i32_0 = arith.constant 0 : i32
    %c0_i32_1 = arith.constant 0 : i32
    return %c0_i32, %c0_i32_0 : i32, i32
  }
  func.func @transform_2(%arg0: i32) -> (i32, i32) {
    %c0_i32 = arith.constant 0 : i32
    %c0_i32_0 = arith.constant 0 : i32
    %c0_i32_1 = arith.constant 0 : i32
    return %c0_i32, %c0_i32_0 : i32, i32
  }
  func.func @transform_3(%arg0: i32) -> (i32, i32) {
    %c0_i32 = arith.constant 0 : i32
    %c0_i32_0 = arith.constant 0 : i32
    %c0_i32_1 = arith.constant 0 : i32
    return %c0_i32, %c0_i32_0 : i32, i32
  }
  func.func @transform_4(%arg0: i32) -> (i32, i32) {
    %c0_i32 = arith.constant 0 : i32
    %c0_i32_0 = arith.constant 0 : i32
    %c0_i32_1 = arith.constant 0 : i32
    return %c0_i32, %c0_i32_0 : i32, i32
  }
  func.func @transform_5(%arg0: i32) -> (i32, i32) {
    %c0_i32 = arith.constant 0 : i32
    %c0_i32_0 = arith.constant 0 : i32
    return %c0_i32, %arg0 : i32, i32
  }
}

</mosaic_0001>

<bundles_post_ra>
// kernel: mlp_forward.1
= control target key start
LH: loop header
LB: loop body
LE: loop exit
PB: predicated region body
PF: predicated region fallthrough
CT: control target
= control target key end

     0   :  { %v157_v0 = vmov 0   ;;  %v132_v47 = vlaneseq  ;;  %s233_s1 = inlined_call_operand.vmem [shape: f32[32,1], index: 1, kind: input, shape index: {}]   ;;  %s234_s2 = inlined_call_operand.vmem [shape: f32[32,1], index: 2, kind: input, shape index: {}]   ;;  %s235_s4 = inlined_call_operand.<no memory space> [shape: f32[1,1], index: 4, kind: input, shape index: {}]   ;;  %s236_s3 = inlined_call_operand.vmem [shape: f32[32,1], index: 3, kind: input, shape index: {}]   ;;  %s237_s0 = inlined_call_operand.vmem [shape: f32[1,128], index: 0, kind: input, shape index: {}]   ;;  %s238_s5 = inlined_call_operand.vmem [shape: f32[1,128], index: 5, kind: output, shape index: {}]  }
   0x1   :  { %152 = vset.pattern.permute.xlu1 %v157_v0  ;;  %151 = vset.pattern.permute.xlu0 %v157_v0  ;;  %v25_v1 = vld [vmem:[%s233_s1 + $0x10] sm:$0xff]  ;;  %v23_v2 = vld [vmem:[%s233_s1] sm:$0xff]  ;;  %v10_v3 = vstv %s235_s4  ;;  %v24_v5 = vld [vmem:[%s233_s1 + $0x8] sm:$0xff] }
   0x2   :  { %39 = vperm.xlu1 %152, %v25_v1   ;;  %29 = vperm.xlu0 %151, %v23_v2   ;;  %11 = vst [vmem:[#allocation2] sm:$0x1] %v10_v3  ;;  %v57_v4 = vld [vmem:[%s234_s2] sm:$0xff]  ;;  %v26_v6 = vld [vmem:[%s233_s1 + $0x18] sm:$0xff]  ;;  %v58_v7 = vld [vmem:[%s234_s2 + $0x8] sm:$0xff]  ;;  %v133_v50 = vshrl.u32 %v132_v47, 7 }
   0x3   :  { %v60_v8 = vld [vmem:[%s234_s2 + $0x18] sm:$0xff]  ;;  %v59_v9 = vld [vmem:[%s234_s2 + $0x10] sm:$0xff]  ;;  %v90_v10 = vld [vmem:[%s236_s3 + $0x8] sm:$0xff] }
   0x4   :  { %v89_v11 = vld [vmem:[%s236_s3] sm:$0xff]  ;;  %v92_v12 = vld [vmem:[%s236_s3 + $0x18] sm:$0xff]  ;;  %v91_v13 = vld [vmem:[%s236_s3 + $0x10] sm:$0xff]  ;;  %v134_v52 = vsub.s32 0, %v133_v50 }
   0x5   :  { %v148_v19 = vld [vmem:[%s237_s0] ss:$0 sm:$0xff] }
   0x6   :  { %63 = vperm.xlu1 %152, %v57_v4   ;;  %34 = vperm.xlu0 %151, %v24_v5  }
   0x9   :  { %v93_v14 = vld [vmem:[#allocation2] sm:$0x1] }
   0xa   :  { %44 = vperm.xlu1 %152, %v26_v6   ;;  %68 = vperm.xlu0 %151, %v58_v7  }
   0xe   :  { %78 = vperm.xlu1 %152, %v60_v8   ;;  %73 = vperm.xlu0 %151, %v59_v9  }
  0x12   :  { %101 = vperm.xlu1 %152, %v90_v10   ;;  %96 = vperm.xlu0 %151, %v89_v11  }
  0x16   :  { %111 = vperm.xlu1 %152, %v92_v12   ;;  %106 = vperm.xlu0 %151, %v91_v13  }
  0x1a   :  { %129 = vperm.xlu0 %151, %v93_v14  }
  0x7d   :  { %v40_v15 = vpop.permute.xlu1 %39  ;;  %v30_v16 = vpop.permute.xlu0 %29 }
  0x7e   :  { %v53_v22 = vmul.f32 %v148_v19, %v30_v16  ;;  %v55_v28 = vmul.f32 %v148_v19, %v40_v15 }
  0x81   :  { %v64_v17 = vpop.permute.xlu1 %63  ;;  %v35_v18 = vpop.permute.xlu0 %34 }
  0x82   :  { %v54_v23 = vmul.f32 %v148_v19, %v35_v18  ;;  %v81_v24 = vadd.f32 %v64_v17, %v53_v22 }
  0x84   :  { %v85_v29 = vmax.f32 %v81_v24, 0.0 }
  0x85   :  { %v45_v20 = vpop.permute.xlu1 %44  ;;  %v69_v21 = vpop.permute.xlu0 %68 }
  0x86   :  { %v82_v25 = vadd.f32 %v69_v21, %v54_v23  ;;  %v56_v30 = vmul.f32 %v148_v19, %v45_v20 }
  0x88   :  { %v86_v31 = vmax.f32 %v82_v25, 0.0 }
  0x89   :  { %v79_v26 = vpop.permute.xlu1 %78  ;;  %v74_v27 = vpop.permute.xlu0 %73 }
  0x8a   :  { %v83_v32 = vadd.f32 %v74_v27, %v55_v28  ;;  %v84_v35 = vadd.f32 %v79_v26, %v56_v30 }
  0x8c   :  { %v87_v38 = vmax.f32 %v83_v32, 0.0  ;;  %v88_v41 = vmax.f32 %v84_v35, 0.0 }
  0x8d   :  { %v102_v33 = vpop.permute.xlu1 %101  ;;  %v97_v34 = vpop.permute.xlu0 %96 }
  0x8e   :  { %v115_v36 = vmul.f32 %v102_v33, %v86_v31  ;;  %v114_v37 = vmul.f32 %v97_v34, %v85_v29 }
  0x90   :  { %v118_v42 = vadd.f32 %v115_v36, %v114_v37 }
  0x91   :  { %v112_v39 = vpop.permute.xlu1 %111  ;;  %v107_v40 = vpop.permute.xlu0 %106 }
  0x92   :  { %v116_v43 = vmul.f32 %v107_v40, %v87_v38  ;;  %v117_v44 = vmul.f32 %v112_v39, %v88_v41 }
  0x94   :  { %v119_v45 = vadd.f32 %v118_v42, %v116_v43 }
  0x95   :  { %v130_v54 = vpop.permute.xlu0 %129 }
  0x96   :  { %v120_v46 = vadd.f32 %v119_v45, %v117_v44  ;;  %v135_v57 = vrot.slane %v130_v54, %v134_v52 }
  0x98   :  { %v121_v48 = vrot.slane %v120_v46, 4 }
  0x9a   :  { %v122_v49 = vadd.f32 %v121_v48, %v120_v46 }
  0x9c   :  { %v123_v51 = vrot.slane %v122_v49, 2 }
  0x9e   :  { %v124_v53 = vadd.f32 %v123_v51, %v122_v49 }
  0xa0   :  { %v125_v55 = vrot.slane %v124_v53, 1 }
  0xa2   :  { %v126_v56 = vadd.f32 %v125_v55, %v124_v53 }
  0xa4   :  { %v136_v58 = vadd.f32 %v135_v57, %v126_v56 }
  0xa6   :  { %v149_v59 = vmul.f32 -1.442695, %v136_v58 }
  0xa8   :  { %153 = vpow2.f32 %v149_v59 }
  0xb5   :  { %v154_v60 = vpop.eup %153 }
  0xb6   :  { %v140_v61 = vadd.f32 1.0, %v154_v60 }
  0xb8   :  { %155 = vrcp.f32 %v140_v61 }
  0xc5   :  { %v156_v62 = vpop.eup %155 }
  0xc6   :  { %143 = vst [vmem:[%s238_s5] sm:$0x1] %v156_v62 }

</bundles_post_ra>
